<compile_context>
chip_gen: v7x
topology: tpu7x:2x2x1
jax: 0.10.0
libtpu: 0.0.40
codegen_flags: <defaults>
</compile_context>

<pallas_src>
import functools

import jax
import jax.numpy as jnp
from jax.experimental import pallas as pl
from jax.experimental.pallas import tpu as pltpu

_LANE = 128
_NEG = -1e30                       # finite "minus infinity" for masking / init
_TILE_BUDGET_BYTES = 32 * 1024 * 1024   # target live working set (buffers+temps)
_VMEM_LIMIT_CAP = 48 * 1024 * 1024      # <= v7x 64 MiB physical with headroom
_MAX_BLOCK_ROWS = 1024


def _round_up(x, m):
    return (x + m - 1) // m * m


def _sublane_packing(dtype):
    # f32 -> 8 sublanes, bf16/f16 -> 16, int8/fp8 -> 32.
    return max(8, 32 // jnp.dtype(dtype).itemsize)


def _kd_loss_kernel(x_ref, t_ref, kl_ref,
                    mx_ref, sx_ref, mt_ref, st_ref, dot_ref, *,
                    inv_temp, batch, classes, block_rows, block_cols,
                    mask_rows, mask_cols):
    i = pl.program_id(0)           # row-tile index ("parallel")
    k = pl.program_id(1)           # class-tile index ("arbitrary", innermost)

    @pl.when(k == 0)
    def _():
        mx_ref[...] = jnp.full_like(mx_ref, _NEG)
        mt_ref[...] = jnp.full_like(mt_ref, _NEG)
        sx_ref[...] = jnp.zeros_like(sx_ref)
        st_ref[...] = jnp.zeros_like(st_ref)
        dot_ref[...] = jnp.zeros_like(dot_ref)

    x = x_ref[...].astype(jnp.float32) * inv_temp
    t = t_ref[...].astype(jnp.float32) * inv_temp

    if mask_cols:
        col = jax.lax.broadcasted_iota(jnp.int32, x.shape, 1) + k * block_cols
        valid = col < classes
        x = jnp.where(valid, x, _NEG)
        t = jnp.where(valid, t, _NEG)

    # --- student: online logsumexp ---
    mx_old = mx_ref[...]
    mx_new = jnp.maximum(mx_old, jnp.max(x, axis=-1, keepdims=True))
    alpha = jnp.exp(mx_old - mx_new)
    sx_ref[...] = alpha * sx_ref[...] + jnp.sum(
        jnp.exp(x - mx_new), axis=-1, keepdims=True)
    mx_ref[...] = mx_new

    # --- teacher: online logsumexp + online numerator sum_c exp(t-m)*(t-x) ---
    mt_old = mt_ref[...]
    mt_new = jnp.maximum(mt_old, jnp.max(t, axis=-1, keepdims=True))
    beta = jnp.exp(mt_old - mt_new)
    exp_t = jnp.exp(t - mt_new)
    # exp_t == 0 covers masked tail columns and -inf teacher logits; the guard
    # keeps inf/NaN from (t - x) out of the accumulator (PyTorch's q>0 rule).
    prod = jnp.where(exp_t > 0.0, exp_t * (t - x), 0.0)
    st_ref[...] = beta * st_ref[...] + jnp.sum(exp_t, axis=-1, keepdims=True)
    dot_ref[...] = beta * dot_ref[...] + jnp.sum(prod, axis=-1, keepdims=True)
    mt_ref[...] = mt_new

    @pl.when(k == pl.num_programs(1) - 1)
    def _():
        log_zx = mx_ref[...] + jnp.log(sx_ref[...])
        log_zt = mt_ref[...] + jnp.log(st_ref[...])
        kl = dot_ref[...] / st_ref[...] - (log_zt - log_zx)
        if mask_rows:
            row = jax.lax.broadcasted_iota(jnp.int32, kl.shape, 0) + i * block_rows
            kl = jnp.where(row < batch, kl, 0.0)
        kl_ref[...] = kl


def kd_loss(inputs, targets, temp_factor, block_rows=None, block_cols=None):
    """Pallas KD loss. inputs/targets: (B, C) logits. Returns scalar f32."""
    B, C = inputs.shape
    assert targets.shape == (B, C)

    packing = max(_sublane_packing(inputs.dtype), _sublane_packing(targets.dtype))
    in_bytes_per_elem = (jnp.dtype(inputs.dtype).itemsize
                         + jnp.dtype(targets.dtype).itemsize)
    c_pad = _round_up(C, _LANE)

    # Live VMEM per (row, padded-lane) tile element:
    #   2 double-buffers per input + ~4 f32 temporaries the compiler materializes.
    per_elem = 2 * in_bytes_per_elem + 4 * 4
    budget_elems = max(_TILE_BUDGET_BYTES // per_elem, packing * _LANE)

    # ---- class tile ----
    if block_cols is not None and block_cols < C:
        tc = max(_LANE, block_cols // _LANE * _LANE)
    elif packing * c_pad > budget_elems:
        # Vocab-sized C: tile the class axis (online logsumexp path).
        tc = max(_LANE, (budget_elems // 128) // _LANE * _LANE)
    else:
        tc = C
    tc_pad = c_pad if tc == C else tc          # tc is a multiple of 128 when < C

    # ---- row tile ----
    b_cap = _round_up(B, packing)
    tb = (budget_elems // tc_pad) // packing * packing
    tb = max(packing, min(tb, b_cap, _MAX_BLOCK_ROWS))
    if block_rows is not None:
        tb = max(packing, min(tb, block_rows // packing * packing))
    # Prefer an even number of row tiles (v7x megacore) if it doesn't halve tiles.
    if pl.cdiv(B, tb) % 2 == 1 and tb > packing:
        for cand in range(tb - packing, packing - 1, -packing):
            if pl.cdiv(B, cand) % 2 == 0 and 2 * cand >= tb:
                tb = cand
                break

    num_row_tiles = pl.cdiv(B, tb)
    num_class_tiles = pl.cdiv(C, tc)
    mask_rows = (B % tb) != 0
    mask_cols = (C % tc) != 0

    # ---- explicit VMEM budget from the physical (padded) tile ----
    est_bytes = (2 * tb * tc_pad * in_bytes_per_elem   # input double-buffers
                 + 4 * tb * tc_pad * 4                 # f32 temporaries
                 + 2 * tb * _LANE * 4                  # output buffers (lane-padded)
                 + 5 * tb * _LANE * 4)                 # accumulator scratch
    vmem_limit = int(min(_VMEM_LIMIT_CAP,
                         max(est_bytes * 3 // 2, 16 * 1024 * 1024)))

    kernel = functools.partial(
        _kd_loss_kernel,
        inv_temp=1.0 / float(temp_factor),
        batch=B, classes=C,
        block_rows=tb, block_cols=tc,
        mask_rows=mask_rows, mask_cols=mask_cols)

    per_row = pl.pallas_call(
        kernel,
        out_shape=jax.ShapeDtypeStruct((B, 1), jnp.float32),
        grid_spec=pltpu.PrefetchScalarGridSpec(
            num_scalar_prefetch=0,
            grid=(num_row_tiles, num_class_tiles),
            in_specs=[
                pl.BlockSpec((tb, tc), lambda i, k: (i, k)),
                pl.BlockSpec((tb, tc), lambda i, k: (i, k)),
            ],
            out_specs=pl.BlockSpec((tb, 1), lambda i, k: (i, 0)),
            scratch_shapes=[pltpu.VMEM((tb, 1), jnp.float32) for _ in range(5)],
        ),
        compiler_params=pltpu.CompilerParams(
            dimension_semantics=("parallel", "arbitrary"),
            vmem_limit_bytes=vmem_limit,
        ),
        cost_estimate=pl.CostEstimate(
            flops=12 * B * C,
            transcendentals=2 * B * C,
            bytes_accessed=B * C * in_bytes_per_elem + B * 4,
        ),
    )(inputs, targets)

    # Tiny final reduction + KD scaling in plain JAX.
    return jnp.sum(per_row) * (float(temp_factor) ** 2 / float(B))


def kd_loss_ref(inputs, targets, temp_factor):
    """Plain-JAX reference mirroring the PyTorch module."""
    log_p = jax.nn.log_softmax(inputs / temp_factor, axis=1)
    q = jax.nn.softmax(targets / temp_factor, axis=1)
    kl = jnp.sum(jnp.where(q > 0, q * (jnp.log(q) - log_p), 0.0))
    return kl * temp_factor ** 2 / inputs.shape[0]


if __name__ == "__main__":
    key = jax.random.PRNGKey(0)
    k1, k2, k3, k4, k5, k6, k7, k8 = jax.random.split(key, 8)

    # Case 1: module-implied small shape (batch, num_classes) -> single tile.
    B, C, T = 8, 32, 4.0
    x = jax.random.normal(k1, (B, C), dtype=jnp.float32)
    t = jax.random.normal(k2, (B, C), dtype=jnp.float32)
    out = kd_loss(x, t, T)
    jax.block_until_ready(out)
    ref = kd_loss_ref(x, t, T)
    assert jnp.allclose(out, ref, rtol=5e-4, atol=1e-5), (out, ref)

    # Case 2: non-multiple-of-8 batch, forced multi-row-tile grid (row masking,
    # no HBM pad copies) + -inf masked teacher logits.
    B2, C2, T2 = 20, 160, 2.0
    x2 = jax.random.normal(k3, (B2, C2), dtype=jnp.float32)
    t2 = jax.random.normal(k4, (B2, C2), dtype=jnp.float32)
    t2 = t2.at[:, :3].set(-jnp.inf)
    out2 = kd_loss(x2, t2, T2, block_rows=8)
    jax.block_until_ready(out2)
    ref2 = kd_loss_ref(x2, t2, T2)
    assert jnp.allclose(out2, ref2, rtol=5e-4, atol=1e-5), (out2, ref2)

    # Case 3: bf16 logits (16-sublane row tiles), f32 compute inside the kernel.
    B3, C3, T3 = 16, 96, 3.0
    x3 = jax.random.normal(k5, (B3, C3), dtype=jnp.float32).astype(jnp.bfloat16)
    t3 = jax.random.normal(k6, (B3, C3), dtype=jnp.float32).astype(jnp.bfloat16)
    out3 = kd_loss(x3, t3, T3)
    jax.block_until_ready(out3)
    ref3 = kd_loss_ref(x3.astype(jnp.float32), t3.astype(jnp.float32), T3)
    assert jnp.allclose(out3, ref3, rtol=2e-3, atol=1e-4), (out3, ref3)

    # Case 4: forced class-axis tiling with a partial tail column block
    # (exercises the online-logsumexp accumulator + column masking).
    B4, C4, T4 = 24, 300, 2.0
    x4 = jax.random.normal(k7, (B4, C4), dtype=jnp.float32)
    t4 = jax.random.normal(k8, (B4, C4), dtype=jnp.float32)
    out4 = kd_loss(x4, t4, T4, block_cols=128)
    jax.block_until_ready(out4)
    ref4 = kd_loss_ref(x4, t4, T4)
    assert jnp.allclose(out4, ref4, rtol=5e-4, atol=1e-5), (out4, ref4)

    print("KERNEL_OK")
</pallas_src>

<mosaic_0001>
module attributes {stable_mosaic.version = 11 : i64} {
  func.func @_kd_loss_kernel(%arg0: i32, %arg1: i32, %arg2: memref<8x32xf32, #tpu.memory_space<vmem>>, %arg3: memref<8x32xf32, #tpu.memory_space<vmem>>, %arg4: memref<8x1xf32, #tpu.memory_space<vmem>>, %arg5: memref<8x1xf32, #tpu.memory_space<vmem>>, %arg6: memref<8x1xf32, #tpu.memory_space<vmem>>, %arg7: memref<8x1xf32, #tpu.memory_space<vmem>>, %arg8: memref<8x1xf32, #tpu.memory_space<vmem>>, %arg9: memref<8x1xf32, #tpu.memory_space<vmem>>) attributes {dimension_semantics = [#tpu.dimension_semantics<parallel>, #tpu.dimension_semantics<arbitrary>], iteration_bounds = array<i64: 1, 1>, scalar_prefetch = 0 : i64, scratch_operands = 5 : i64, tpu.core_type = #tpu.core_type<tc>, window_params = [{transform_indices = @transform_0, window_bounds = array<i64: 8, 32>}, {transform_indices = @transform_1, window_bounds = array<i64: 8, 32>}, {transform_indices = @transform_2, window_bounds = array<i64: 8, 1>}]} {
    %c0_i32 = arith.constant 0 : i32
    %0 = arith.cmpi eq, %arg1, %c0_i32 : i32
    %1 = arith.extui %0 : i1 to i32
    %c0_i32_0 = arith.constant 0 : i32
    %2 = arith.cmpi ne, %1, %c0_i32_0 : i32
    scf.if %2 {
      %cst_34 = arith.constant -1.000000e+30 : f32
      %56 = vector.broadcast %cst_34 : f32 to vector<8x1xf32>
      %c0_35 = arith.constant 0 : index
      %c0_36 = arith.constant 0 : index
      %57 = vector.load %arg5[%c0_35, %c0_36] : memref<8x1xf32, #tpu.memory_space<vmem>>, vector<8x1xf32>
      tpu.vector_store %arg5[%c0_35, %c0_36], %56 {strides = array<i32>} : memref<8x1xf32, #tpu.memory_space<vmem>>, vector<8x1xf32>,
      %cst_37 = arith.constant -1.000000e+30 : f32
      %58 = vector.broadcast %cst_37 : f32 to vector<8x1xf32>
      %c0_38 = arith.constant 0 : index
      %c0_39 = arith.constant 0 : index
      %59 = vector.load %arg7[%c0_38, %c0_39] : memref<8x1xf32, #tpu.memory_space<vmem>>, vector<8x1xf32>
      tpu.vector_store %arg7[%c0_38, %c0_39], %58 {strides = array<i32>} : memref<8x1xf32, #tpu.memory_space<vmem>>, vector<8x1xf32>,
      %cst_40 = arith.constant 0.000000e+00 : f32
      %60 = vector.broadcast %cst_40 : f32 to vector<8x1xf32>
      %c0_41 = arith.constant 0 : index
      %c0_42 = arith.constant 0 : index
      %61 = vector.load %arg6[%c0_41, %c0_42] : memref<8x1xf32, #tpu.memory_space<vmem>>, vector<8x1xf32>
      tpu.vector_store %arg6[%c0_41, %c0_42], %60 {strides = array<i32>} : memref<8x1xf32, #tpu.memory_space<vmem>>, vector<8x1xf32>,
      %cst_43 = arith.constant 0.000000e+00 : f32
      %62 = vector.broadcast %cst_43 : f32 to vector<8x1xf32>
      %c0_44 = arith.constant 0 : index
      %c0_45 = arith.constant 0 : index
      %63 = vector.load %arg8[%c0_44, %c0_45] : memref<8x1xf32, #tpu.memory_space<vmem>>, vector<8x1xf32>
      tpu.vector_store %arg8[%c0_44, %c0_45], %62 {strides = array<i32>} : memref<8x1xf32, #tpu.memory_space<vmem>>, vector<8x1xf32>,
      %cst_46 = arith.constant 0.000000e+00 : f32
      %64 = vector.broadcast %cst_46 : f32 to vector<8x1xf32>
      %c0_47 = arith.constant 0 : index
      %c0_48 = arith.constant 0 : index
      %65 = vector.load %arg9[%c0_47, %c0_48] : memref<8x1xf32, #tpu.memory_space<vmem>>, vector<8x1xf32>
      tpu.vector_store %arg9[%c0_47, %c0_48], %64 {strides = array<i32>} : memref<8x1xf32, #tpu.memory_space<vmem>>, vector<8x1xf32>,
    } else {
    }
    %c0 = arith.constant 0 : index
    %c0_1 = arith.constant 0 : index
    %3 = vector.load %arg2[%c0, %c0_1] : memref<8x32xf32, #tpu.memory_space<vmem>>, vector<8x32xf32>
    %cst = arith.constant 2.500000e-01 : f32
    %4 = vector.broadcast %cst : f32 to vector<8x32xf32>
    %5 = arith.mulf %3, %4 : vector<8x32xf32>
    %c0_2 = arith.constant 0 : index
    %c0_3 = arith.constant 0 : index
    %6 = vector.load %arg3[%c0_2, %c0_3] : memref<8x32xf32, #tpu.memory_space<vmem>>, vector<8x32xf32>
    %cst_4 = arith.constant 2.500000e-01 : f32
    %7 = vector.broadcast %cst_4 : f32 to vector<8x32xf32>
    %8 = arith.mulf %6, %7 : vector<8x32xf32>
    %c0_5 = arith.constant 0 : index
    %c0_6 = arith.constant 0 : index
    %9 = vector.load %arg5[%c0_5, %c0_6] : memref<8x1xf32, #tpu.memory_space<vmem>>, vector<8x1xf32>
    %cst_7 = arith.constant dense<0xFF800000> : vector<8xf32>
    %10 = vector.multi_reduction <maximumf>, %5, %cst_7 [1] : vector<8x32xf32> to vector<8xf32>
    %11 = vector.shape_cast %10 : vector<8xf32> to vector<8x1xf32>
    %12 = arith.maximumf %9, %11 : vector<8x1xf32>
    %13 = arith.subf %9, %12 : vector<8x1xf32>
    %14 = math.exp %13 : vector<8x1xf32>
    %c0_8 = arith.constant 0 : index
    %c0_9 = arith.constant 0 : index
    %15 = vector.load %arg6[%c0_8, %c0_9] : memref<8x1xf32, #tpu.memory_space<vmem>>, vector<8x1xf32>
    %16 = arith.mulf %14, %15 : vector<8x1xf32>
    %17 = vector.broadcast %12 : vector<8x1xf32> to vector<8x32xf32>
    %18 = arith.subf %5, %17 : vector<8x32xf32>
    %19 = math.exp %18 : vector<8x32xf32>
    %cst_10 = arith.constant dense<0.000000e+00> : vector<8xf32>
    %20 = vector.multi_reduction <add>, %19, %cst_10 [1] : vector<8x32xf32> to vector<8xf32>
    %21 = vector.shape_cast %20 : vector<8xf32> to vector<8x1xf32>
    %22 = arith.addf %16, %21 : vector<8x1xf32>
    %c0_11 = arith.constant 0 : index
    %c0_12 = arith.constant 0 : index
    %23 = vector.load %arg6[%c0_11, %c0_12] : memref<8x1xf32, #tpu.memory_space<vmem>>, vector<8x1xf32>
    tpu.vector_store %arg6[%c0_11, %c0_12], %22 {strides = array<i32>} : memref<8x1xf32, #tpu.memory_space<vmem>>, vector<8x1xf32>,
    %c0_13 = arith.constant 0 : index
    %c0_14 = arith.constant 0 : index
    %24 = vector.load %arg5[%c0_13, %c0_14] : memref<8x1xf32, #tpu.memory_space<vmem>>, vector<8x1xf32>
    tpu.vector_store %arg5[%c0_13, %c0_14], %12 {strides = array<i32>} : memref<8x1xf32, #tpu.memory_space<vmem>>, vector<8x1xf32>,
    %c0_15 = arith.constant 0 : index
    %c0_16 = arith.constant 0 : index
    %25 = vector.load %arg7[%c0_15, %c0_16] : memref<8x1xf32, #tpu.memory_space<vmem>>, vector<8x1xf32>
    %cst_17 = arith.constant dense<0xFF800000> : vector<8xf32>
    %26 = vector.multi_reduction <maximumf>, %8, %cst_17 [1] : vector<8x32xf32> to vector<8xf32>
    %27 = vector.shape_cast %26 : vector<8xf32> to vector<8x1xf32>
    %28 = arith.maximumf %25, %27 : vector<8x1xf32>
    %29 = arith.subf %25, %28 : vector<8x1xf32>
    %30 = math.exp %29 : vector<8x1xf32>
    %31 = vector.broadcast %28 : vector<8x1xf32> to vector<8x32xf32>
    %32 = arith.subf %8, %31 : vector<8x32xf32>
    %33 = math.exp %32 : vector<8x32xf32>
    %cst_18 = arith.constant 0.000000e+00 : f32
    %34 = vector.broadcast %cst_18 : f32 to vector<8x32xf32>
    %35 = arith.cmpf ogt, %33, %34 : vector<8x32xf32>
    %36 = arith.subf %8, %5 : vector<8x32xf32>
    %37 = arith.mulf %33, %36 : vector<8x32xf32>
    %cst_19 = arith.constant 0.000000e+00 : f32
    %38 = vector.broadcast %cst_19 : f32 to vector<8x32xf32>
    %39 = arith.select %35, %37, %38 : vector<8x32xi1>, vector<8x32xf32>
    %c0_20 = arith.constant 0 : index
    %c0_21 = arith.constant 0 : index
    %40 = vector.load %arg8[%c0_20, %c0_21] : memref<8x1xf32, #tpu.memory_space<vmem>>, vector<8x1xf32>
    %41 = arith.mulf %30, %40 : vector<8x1xf32>
    %cst_22 = arith.constant dense<0.000000e+00> : vector<8xf32>
    %42 = vector.multi_reduction <add>, %33, %cst_22 [1] : vector<8x32xf32> to vector<8xf32>
    %43 = vector.shape_cast %42 : vector<8xf32> to vector<8x1xf32>
    %44 = arith.addf %41, %43 : vector<8x1xf32>
    %c0_23 = arith.constant 0 : index
    %c0_24 = arith.constant 0 : index
    %45 = vector.load %arg8[%c0_23, %c0_24] : memref<8x1xf32, #tpu.memory_space<vmem>>, vector<8x1xf32>
    tpu.vector_store %arg8[%c0_23, %c0_24], %44 {strides = array<i32>} : memref<8x1xf32, #tpu.memory_space<vmem>>, vector<8x1xf32>,
    %c0_25 = arith.constant 0 : index
    %c0_26 = arith.constant 0 : index
    %46 = vector.load %arg9[%c0_25, %c0_26] : memref<8x1xf32, #tpu.memory_space<vmem>>, vector<8x1xf32>
    %47 = arith.mulf %30, %46 : vector<8x1xf32>
    %cst_27 = arith.constant dense<0.000000e+00> : vector<8xf32>
    %48 = vector.multi_reduction <add>, %39, %cst_27 [1] : vector<8x32xf32> to vector<8xf32>
    %49 = vector.shape_cast %48 : vector<8xf32> to vector<8x1xf32>
    %50 = arith.addf %47, %49 : vector<8x1xf32>
    %c0_28 = arith.constant 0 : index
    %c0_29 = arith.constant 0 : index
    %51 = vector.load %arg9[%c0_28, %c0_29] : memref<8x1xf32, #tpu.memory_space<vmem>>, vector<8x1xf32>
    tpu.vector_store %arg9[%c0_28, %c0_29], %50 {strides = array<i32>} : memref<8x1xf32, #tpu.memory_space<vmem>>, vector<8x1xf32>,
    %c0_30 = arith.constant 0 : index
    %c0_31 = arith.constant 0 : index
    %52 = vector.load %arg7[%c0_30, %c0_31] : memref<8x1xf32, #tpu.memory_space<vmem>>, vector<8x1xf32>
    tpu.vector_store %arg7[%c0_30, %c0_31], %28 {strides = array<i32>} : memref<8x1xf32, #tpu.memory_space<vmem>>, vector<8x1xf32>,
    %c0_i32_32 = arith.constant 0 : i32
    %53 = arith.cmpi eq, %arg1, %c0_i32_32 : i32
    %54 = arith.extui %53 : i1 to i32
    %c0_i32_33 = arith.constant 0 : i32
    %55 = arith.cmpi ne, %54, %c0_i32_33 : i32
    scf.if %55 {
      %c0_34 = arith.constant 0 : index
      %c0_35 = arith.constant 0 : index
      %56 = vector.load %arg5[%c0_34, %c0_35] : memref<8x1xf32, #tpu.memory_space<vmem>>, vector<8x1xf32>
      %c0_36 = arith.constant 0 : index
      %c0_37 = arith.constant 0 : index
      %57 = vector.load %arg6[%c0_36, %c0_37] : memref<8x1xf32, #tpu.memory_space<vmem>>, vector<8x1xf32>
      %58 = math.log %57 : vector<8x1xf32>
      %59 = arith.addf %56, %58 : vector<8x1xf32>
      %c0_38 = arith.constant 0 : index
      %c0_39 = arith.constant 0 : index
      %60 = vector.load %arg7[%c0_38, %c0_39] : memref<8x1xf32, #tpu.memory_space<vmem>>, vector<8x1xf32>
      %c0_40 = arith.constant 0 : index
      %c0_41 = arith.constant 0 : index
      %61 = vector.load %arg8[%c0_40, %c0_41] : memref<8x1xf32, #tpu.memory_space<vmem>>, vector<8x1xf32>
      %62 = math.log %61 : vector<8x1xf32>
      %63 = arith.addf %60, %62 : vector<8x1xf32>
      %c0_42 = arith.constant 0 : index
      %c0_43 = arith.constant 0 : index
      %64 = vector.load %arg9[%c0_42, %c0_43] : memref<8x1xf32, #tpu.memory_space<vmem>>, vector<8x1xf32>
      %c0_44 = arith.constant 0 : index
      %c0_45 = arith.constant 0 : index
      %65 = vector.load %arg8[%c0_44, %c0_45] : memref<8x1xf32, #tpu.memory_space<vmem>>, vector<8x1xf32>
      %66 = arith.divf %64, %65 : vector<8x1xf32>
      %67 = arith.subf %63, %59 : vector<8x1xf32>
      %68 = arith.subf %66, %67 : vector<8x1xf32>
      %c0_46 = arith.constant 0 : index
      %c0_47 = arith.constant 0 : index
      %69 = vector.load %arg4[%c0_46, %c0_47] : memref<8x1xf32, #tpu.memory_space<vmem>>, vector<8x1xf32>
      tpu.vector_store %arg4[%c0_46, %c0_47], %68 {strides = array<i32>} : memref<8x1xf32, #tpu.memory_space<vmem>>, vector<8x1xf32>,
    } else {
    }
    return
  }
  func.func @transform_0(%arg0: i32, %arg1: i32) -> (i32, i32) {
    %c0_i32 = arith.constant 0 : i32
    return %arg0, %arg1 : i32, i32
  }
  func.func @transform_1(%arg0: i32, %arg1: i32) -> (i32, i32) {
    %c0_i32 = arith.constant 0 : i32
    return %arg0, %arg1 : i32, i32
  }
  func.func @transform_2(%arg0: i32, %arg1: i32) -> (i32, i32) {
    %c0_i32 = arith.constant 0 : i32
    %c0_i32_0 = arith.constant 0 : i32
    return %arg0, %c0_i32 : i32, i32
  }
}

</mosaic_0001>

<bundles_post_ra>
// kernel: tpu_custom_call.1
= control target key start
LH: loop header
LB: loop body
LE: loop exit
PB: predicated region body
PF: predicated region fallthrough
CT: control target
= control target key end

     0   :  { %7 = vsyncpa [#allocation8], 0  ;;  %s267_s0 = inlined_call_operand.hbm [shape: f32[8,32], index: 0, kind: input, shape index: {}]   ;;  %s268_s1 = inlined_call_operand.hbm [shape: f32[8,32], index: 1, kind: input, shape index: {}]   ;;  %s269_s2 = inlined_call_operand.vmem [shape: f32[8,1], index: 2, kind: output, shape index: {}]  }
   0x1   :  { %8 = vsyncpa [#allocation10], 0  ;;  %s204_s9 = smov [#allocation7]   ;;  %s205_s11 = smov [#allocation9]  }
   0x2   :  { %s15_s10 = sshll.u32 %s204_s9, 4  ;;  %s25_s12 = sshll.u32 %s205_s11, 4  ;;  %s16_s10 = int_to_ptr.vmem [resolvable:$true] %s15_s10  ;;  %s26_s12 = int_to_ptr.vmem [resolvable:$true] %s25_s12 }
   0x3   :  { %s156_s15 = scalar_lea.hbm %s267_s0, 128 }
   0x4   :  { %p157_p0 = scmp.ne.s32.totalorder %s267_s0, %s156_s15  ;;  %p160_p1 = scmp.lt.u32.totalorder %s156_s15, %s267_s0 }
   0x6   :  { %p162_p2 = pnand %p160_p1, %p157_p0 }
   0x8   :  { %165 = shalt.err (!%p162_p2)
}
   0x9   :  { %s166_s20 = scalar_lea.vmem %s16_s10, 128  ;;  %p171_p4 = scmp.lt.s32.totalorder %s16_s10, %s16_s10 }
   0xa   :  { %p167_p3 = scmp.ne.s32.totalorder %s16_s10, %s166_s20  ;;  %p172_p5 = scmp.lt.s32.totalorder %s166_s20, %s166_s20 }
   0xc   :  { %p173_p6 = por %p172_p5, %p171_p4 }
   0xe   :  { %p174_p7 = pnand %p173_p6, %p167_p3 }
  0x10   :  { %177 = shalt.err (!%p174_p7)
}
  0x11   :  { %18 = dma.hbm_to_vmem [thread:$0]  %s267_s0, 128, %s16_s10, [#allocation8]  }
  0x12   :  { %s178_s25 = scalar_lea.hbm %s268_s1, 128 }
  0x13   :  { %p179_p8 = scmp.ne.s32.totalorder %s268_s1, %s178_s25  ;;  %p182_p9 = scmp.lt.u32.totalorder %s178_s25, %s268_s1 }
  0x15   :  { %p184_p10 = pnand %p182_p9, %p179_p8 }
  0x17   :  { %187 = shalt.err (!%p184_p10)
}
  0x18   :  { %s188_s30 = scalar_lea.vmem %s26_s12, 128  ;;  %p193_p12 = scmp.lt.s32.totalorder %s26_s12, %s26_s12 }
  0x19   :  { %p189_p11 = scmp.ne.s32.totalorder %s26_s12, %s188_s30  ;;  %p194_p13 = scmp.lt.s32.totalorder %s188_s30, %s188_s30 }
  0x1b   :  { %p195_p0 = por %p194_p13, %p193_p12 }
  0x1d   :  { %p196_p1 = pnand %p195_p0, %p189_p11 }
  0x1f   :  { %199 = shalt.err (!%p196_p1)
}
  0x20   :  { %28 = dma.hbm_to_vmem [thread:$0]  %s268_s1, 128, %s26_s12, [#allocation10]  }
  0x21   :  { %200 = dma.done.wait [#allocation8], 128  }
  0x22   :  { %201 = vsyncadd [#allocation8], 4294967168 }
  0x23   :  { %202 = dma.done.wait [#allocation10], 128  }
  0x24   :  { %203 = vsyncadd [#allocation10], 4294967168  ;;  %vm39_vm0 = vcmask 7168   ;;  %v206_v0 = vmov -1e+30   ;;  %v45_v1 = vld [vmem:[#allocation7] sm:$0xff] }
  0x25   :  { %40 = vst.msk [vmem:[#allocation2] sm:$0xff] %vm39_vm0, %v206_v0  ;;  %41 = vst.msk [vmem:[#allocation4] sm:$0xff] %vm39_vm0, %v206_v0  ;;  %vm50_vm1 = vcmask 261120   ;;  %v47_v2 = vld [vmem:[#allocation9] sm:$0xff]  ;;  %v46_v3 = vmul.f32 0.25, %v45_v1  ;;  %v207_v7 = vmov 0  }
  0x26   :  { %v48_v4 = vmul.f32 0.25, %v47_v2  ;;  %140 = vset.pattern.permute.xlu1 %v207_v7  ;;  %141 = vset.pattern.permute.xlu0 %v207_v7  ;;  %v208_v8 = vmov 0.0  }
  0x27   :  { %v51_v5 = vsel %vm50_vm1, %v46_v3, -inf  ;;  %42 = vst.msk [vmem:[#allocation3] sm:$0xff] %vm39_vm0, %v208_v8  ;;  %43 = vst.msk [vmem:[#allocation5] sm:$0xff] %vm39_vm0, %v208_v8 }
  0x28   :  { %52 = vmax.xlane.f32.xlu0 %v51_v5  ;;  %v76_v6 = vsel %vm50_vm1, %v48_v4, -inf  ;;  %44 = vst.msk [vmem:[#allocation6] sm:$0xff] %vm39_vm0, %v208_v8  ;;  %v92_v25 = vsub.f32 %v48_v4, %v46_v3 }
  0x2c   :  { %77 = vmax.xlane.f32.xlu0 %v76_v6  ;;  %v49_v9 = vld [vmem:[#allocation2] sm:$0xff]  ;;  %v75_v12 = vld [vmem:[#allocation4] sm:$0xff] }
  0x2e   :  { %v58_v34 = vld [vmem:[#allocation3] sm:$0xff]  ;;  %v95_v38 = vld [vmem:[#allocation5] sm:$0xff] }
  0x2f   :  { %v102_v41 = vld [vmem:[#allocation6] sm:$0xff] }
  0xb5   :  { %v53_v10 = vpop.xlane.xlu0 %52 }
  0xb6   :  { %v54_v11 = vmax.f32 %v49_v9, %v53_v10 }
  0xb8   :  { %v55_v13 = vsub.f32 %v49_v9, %v54_v11  ;;  %74 = vst.msk [vmem:[#allocation2] sm:$0xff] %vm39_vm0, %v54_v11  ;;  %62 = vperm.xlu1 %140, %v54_v11  }
  0xb9   :  { %v78_v14 = vpop.xlane.xlu0 %77 }
  0xba   :  { %v79_v15 = vmax.f32 %v75_v12, %v78_v14  ;;  %v56_v31 = vmul.f32 1.442695, %v55_v13 }
  0xbc   :  { %v80_v16 = vsub.f32 %v75_v12, %v79_v15  ;;  %109 = vst.msk [vmem:[#allocation4] sm:$0xff] %vm39_vm0, %v79_v15  ;;  %85 = vperm.xlu1 %140, %v79_v15  }
  0xbe   :  { %v81_v32 = vmul.f32 1.442695, %v80_v16 }
  0xbf   :  { %v113_v54 = vld [vmem:[#allocation2] sm:$0xff] }
  0xc3   :  { %v118_v55 = vld [vmem:[#allocation4] sm:$0xff] }
 0x137   :  { %v63_v17 = vpop.permute.xlu1 %62 }
 0x138   :  { %v65_v18 = vsub.f32 %v46_v3, %v63_v17 }
 0x13a   :  { %v66_v19 = vmul.f32 1.442695, %v65_v18 }
 0x13b   :  { %v86_v20 = vpop.permute.xlu1 %85 }
 0x13c   :  { %142 = vpow2.f32 %v66_v19  ;;  %v88_v21 = vsub.f32 %v48_v4, %v86_v20 }
 0x13e   :  { %v89_v22 = vmul.f32 1.442695, %v88_v21 }
 0x140   :  { %144 = vpow2.f32 %v89_v22 }
 0x141   :  { %146 = vpow2.f32 %v56_v31 }
 0x142   :  { %148 = vpow2.f32 %v81_v32 }
 0x146   :  { %v143_v23 = vpop.eup %142 }
 0x147   :  { %v68_v24 = vsel %vm50_vm1, %v143_v23, 0.0 }
 0x148   :  { %69 = vadd.xlane.f32.xlu0 %v68_v24 }
 0x14a   :  { %v145_v26 = vpop.eup %144 }
 0x14b   :  { %v97_v27 = vsel %vm50_vm1, %v145_v26, 0.0  ;;  %vm91_vm2 = vcmp.gt.f32.partialorder %v145_v26, 0.0  ;;  %v93_v28 = vmul.f32 %v145_v26, %v92_v25  ;;  %v147_v33 = vpop.eup %146 }
 0x14c   :  { %98 = vadd.xlane.f32.xlu1 %v97_v27  ;;  %v59_v35 = vmul.f32 %v147_v33, %v58_v34  ;;  %v149_v36 = vpop.eup %148 }
 0x14d   :  { %v94_v29 = vsel %vm91_vm2, %v93_v28, 0.0  ;;  %v96_v40 = vmul.f32 %v149_v36, %v95_v38  ;;  %v103_v44 = vmul.f32 %v149_v36, %v102_v41 }
 0x14e   :  { %v104_v30 = vsel %vm50_vm1, %v94_v29, 0.0 }
 0x14f   :  { %105 = vadd.xlane.f32.xlu0 %v104_v30 }
 0x1d5   :  { %v70_v37 = vpop.xlane.xlu0 %69 }
 0x1d6   :  { %v71_v39 = vadd.f32 %v70_v37, %v59_v35 }
 0x1d8   :  { %73 = vst.msk [vmem:[#allocation3] sm:$0xff] %vm39_vm0, %v71_v39 }
 0x1d9   :  { %v99_v42 = vpop.xlane.xlu1 %98 }
 0x1da   :  { %v100_v43 = vadd.f32 %v99_v42, %v96_v40 }
 0x1dc   :  { %101 = vst.msk [vmem:[#allocation5] sm:$0xff] %vm39_vm0, %v100_v43  ;;  %v106_v45 = vpop.xlane.xlu0 %105 }
 0x1dd   :  { %v107_v46 = vadd.f32 %v106_v45, %v103_v44 }
 0x1df   :  { %v114_v47 = vld [vmem:[#allocation3] sm:$0xff]  ;;  %108 = vst.msk [vmem:[#allocation6] sm:$0xff] %vm39_vm0, %v107_v46 }
 0x1e0   :  { %150 = vlog2.f32 %v114_v47 }
 0x1e3   :  { %v119_v48 = vld [vmem:[#allocation5] sm:$0xff] }
 0x1e4   :  { %152 = vlog2.f32 %v119_v48 }
 0x1e5   :  { %154 = vrcp.f32 %v119_v48 }
 0x1e6   :  { %v123_v58 = vld [vmem:[#allocation6] sm:$0xff] }
 0x1ea   :  { %v151_v49 = vpop.eup %150 }
 0x1eb   :  { %v116_v50 = vmul.f32 0.6931472, %v151_v49 }
 0x1ed   :  { %v117_v56 = vadd.f32 %v116_v50, %v113_v54 }
 0x1ee   :  { %v153_v51 = vpop.eup %152 }
 0x1ef   :  { %v121_v52 = vmul.f32 0.6931472, %v153_v51  ;;  %v155_v53 = vpop.eup %154 }
 0x1f0   :  { %v125_v59 = vmul.f32 %v155_v53, %v123_v58 }
 0x1f1   :  { %v122_v57 = vadd.f32 %v121_v52, %v118_v55 }
 0x1f3   :  { %v126_v60 = vsub.f32 %v122_v57, %v117_v56 }
 0x1f5   :  { %v127_v61 = vsub.f32 %v125_v59, %v126_v60 }
 0x1f7   :  { %128 = vst.msk [vmem:[%s269_s2] sm:$0xff] %vm39_vm0, %v127_v61 }
 0x1f8   :  { %133 = vsyncpa [#allocation8], 1 }
 0x1f9   :  { %134 = vsyncpa [#allocation10], 1 }

</bundles_post_ra>
